<compile_context>
chip_gen: v5e
topology: v5e:2x2
jax: 0.10.0
libtpu: 0.0.40
codegen_flags: <defaults>
</compile_context>

<pallas_src>
import jax
import jax.numpy as jnp
from jax.experimental import pallas as pl
from jax.experimental.pallas import tpu as pltpu

LANE = 128                                  # vreg lane width
_HAS_BUFFERED = hasattr(pl, "Buffered")     # feature-detect once at import


def fcnn_kernel(x_ref, w1_ref, b1_ref, w2_ref, b2_ref, w3_ref, b3_ref, o_ref):
    # Cast x to the MXU operand dtype in-register (no host-side pad/convert
    # pass over the activation).
    x = x_ref[...].astype(w1_ref.dtype)
    # Layer 1: Linear(in -> hidden).  K = in_dim (un-padded); Mosaic masks the
    # K remainder.  f32 accumulation on the MXU.
    h = jnp.dot(x, w1_ref[...], preferred_element_type=jnp.float32) + b1_ref[...]
    # Bias-add + tanh stay in f32 (v5e VPU/EUP have no bf16 path).
    # Do NOT move the .astype() before the tanh.
    h = jnp.tanh(h).astype(w2_ref.dtype)
    # Layer 2: Linear(hidden -> hidden) + tanh.
    h = jnp.dot(h, w2_ref[...], preferred_element_type=jnp.float32) + b2_ref[...]
    h = jnp.tanh(h).astype(w3_ref.dtype)
    # Layer 3: Linear(hidden -> out), no activation.
    y = jnp.dot(h, w3_ref[...], preferred_element_type=jnp.float32) + b3_ref[...]
    o_ref[...] = y.astype(o_ref.dtype)


def _round_up(n, m):
    return ((n + m - 1) // m) * m


def _sublane_min(dtype):
    # Minimum second-to-last tile dim: 8 for 4-byte, 16 for 2-byte, 32 for 1-byte.
    return max(8, 32 // jnp.dtype(dtype).itemsize)


def _pad2d(a, rows, cols):
    r, c = a.shape
    if r == rows and c == cols:
        return a
    return jnp.pad(a, ((0, rows - r), (0, cols - c)))


def _vmem_capacity_bytes():
    # Capability probe only (NOT an error-masking kernel fallback): default to
    # the smallest per-TC VMEM (v7x: 64 MiB) if the query is unavailable.
    try:
        return int(pltpu.get_tpu_info().vmem_capacity_bytes)
    except Exception:
        return 64 * 1024 * 1024


def _vmem_limit(batch_tile, in_dim, hid_p, out_p, x_dtype, w_dtype, out_dtype,
                x_buffers):
    wrep = 1 if _HAS_BUFFERED else 2          # single- vs double-buffered weights
    wbytes = jnp.dtype(w_dtype).itemsize
    weights = (in_dim * hid_p + hid_p * hid_p + hid_p * out_p) * wbytes * wrep
    biases = (2 * hid_p + out_p) * 4 * wrep
    x_tile = batch_tile * in_dim * jnp.dtype(x_dtype).itemsize * max(2, x_buffers)
    o_tile = batch_tile * out_p * jnp.dtype(out_dtype).itemsize * 2
    inter = 2 * batch_tile * hid_p * 4        # materialized inter-layer h temporaries (f32)
    need = weights + biases + x_tile + o_tile + inter
    cap = _vmem_capacity_bytes() - (8 << 20)  # leave room for Mosaic internal scratch
    if need > cap:
        # TODO(synk): K-tile w2 over an extra "arbitrary" grid axis with an f32
        # accumulator scratch for hidden >~ 2048 f32 (~3000 bf16) on v7x.
        raise ValueError(
            f"FCNN buffers need ~{need >> 20} MiB VMEM but only {cap >> 20} MiB "
            f"is available; reduce hidden/batch_tile or use bf16 weights.")
    return min(max(int(need * 1.25) + (4 << 20), 16 << 20), cap)


def _build_call(batch, batch_tile, in_dim, hid_p, out_p,
                x_dtype, w_dtype, out_dtype, x_buffers, vmem_limit_bytes):
    grid = (pl.cdiv(batch, batch_tile),)

    def resident(shape):
        # Whole-array block, constant index_map -> DMA'd once, resident in VMEM
        # across all batch-grid steps; single-buffered to halve the footprint.
        if _HAS_BUFFERED:
            return pl.BlockSpec(shape, lambda i: (0, 0),
                                pipeline_mode=pl.Buffered(1))
        return pl.BlockSpec(shape, lambda i: (0, 0))

    if _HAS_BUFFERED and x_buffers != 2:
        x_spec = pl.BlockSpec((batch_tile, in_dim), lambda i: (i, 0),
                              pipeline_mode=pl.Buffered(x_buffers))
    else:
        x_spec = pl.BlockSpec((batch_tile, in_dim), lambda i: (i, 0))

    w_item = jnp.dtype(w_dtype).itemsize
    flops = 2 * batch * (in_dim * hid_p + hid_p * hid_p + hid_p * out_p)
    transcendentals = 2 * batch * hid_p
    bytes_accessed = (batch * in_dim * jnp.dtype(x_dtype).itemsize
                      + (in_dim * hid_p + hid_p * hid_p + hid_p * out_p) * w_item
                      + (2 * hid_p + out_p) * 4
                      + batch * out_p * jnp.dtype(out_dtype).itemsize)

    return pl.pallas_call(
        fcnn_kernel,
        out_shape=jax.ShapeDtypeStruct((batch, out_p), out_dtype),
        grid_spec=pltpu.PrefetchScalarGridSpec(
            num_scalar_prefetch=0,
            grid=grid,
            in_specs=[
                x_spec,                      # x tile (un-padded K; cast in-kernel)
                resident((in_dim, hid_p)),   # w1 (pre-transposed: in x hidden)
                resident((1, hid_p)),        # b1 (f32)
                resident((hid_p, hid_p)),    # w2
                resident((1, hid_p)),        # b2
                resident((hid_p, out_p)),    # w3
                resident((1, out_p)),        # b3
            ],
            out_specs=pl.BlockSpec((batch_tile, out_p), lambda i: (i, 0)),
        ),
        compiler_params=pltpu.CompilerParams(
            dimension_semantics=("parallel",),   # batch axis shards across TCs (v7x)
            vmem_limit_bytes=vmem_limit_bytes,
        ),
        cost_estimate=pl.CostEstimate(
            flops=flops, transcendentals=transcendentals,
            bytes_accessed=bytes_accessed),
    )


def fcnn_forward(x, params, *, batch_tile=None, compute_dtype=jnp.bfloat16,
                 out_dtype=None, x_buffers=2, hidden_align=LANE):
    """Fused 3-layer MLP forward.  x: (B, in_dim); weights in (in, out) layout.

    compute_dtype: MXU operand dtype.  bf16 default: ~2-3x MXU throughput and
      half the weight DMA/VMEM on v5e/v6e/v7x; accumulation stays f32.
    out_dtype: output dtype (default x.dtype); pass bf16 to halve writeback.
    hidden_align: multiple of 128; 256 is worth measuring on v6e/v7x when
      hidden % 256 == 128 (MXU is 2x256^2).
    x_buffers: pipelining depth for the x tile (sweep 3 on v5e where the x DMA
      is more exposed).
    """
    w1, b1, w2, b2, w3, b3 = params
    B, in_dim = x.shape
    hidden = w1.shape[1]
    out_dim = w3.shape[1]
    if out_dtype is None:
        out_dtype = x.dtype
    assert hidden_align % LANE == 0

    # Pad hidden/out feature dims to full lane multiples (exact for Linear+tanh:
    # padded rows/cols are zero, tanh(0)=0) -> dense MXU columns and a
    # lane-dense (unmasked) output store.  K (= in_dim) is NOT padded and x is
    # never touched on the host.
    hid_p = _round_up(hidden, hidden_align)
    out_p = _round_up(out_dim, LANE)

    w1_p = _pad2d(w1, in_dim, hid_p).astype(compute_dtype)
    w2_p = _pad2d(w2, hid_p, hid_p).astype(compute_dtype)
    w3_p = _pad2d(w3, hid_p, out_p).astype(compute_dtype)
    b1_p = _pad2d(b1.reshape(1, -1), 1, hid_p).astype(jnp.float32)
    b2_p = _pad2d(b2.reshape(1, -1), 1, hid_p).astype(jnp.float32)
    b3_p = _pad2d(b3.reshape(1, -1), 1, out_p).astype(jnp.float32)

    # Sublane minimum of the refs the batch axis actually tiles (x and out keep
    # their own dtypes; compute_dtype lives only in vregs).
    sub = max(_sublane_min(x.dtype), _sublane_min(out_dtype))
    if batch_tile is None:
        # Aim for >= 2 grid steps (v7x has 2 TCs); cap the tile so intermediates
        # plus double buffers stay inside the VMEM budget at wide hidden.
        cap = 256 if hid_p >= 2048 else 512
        batch_tile = min(cap, max(sub, _round_up(pl.cdiv(B, 2), sub)))
    batch_tile = max(sub, _round_up(batch_tile, sub))

    vmem_limit = _vmem_limit(batch_tile, in_dim, hid_p, out_p,
                             x.dtype, compute_dtype, out_dtype, x_buffers)

    y = _build_call(B, batch_tile, in_dim, hid_p, out_p,
                    x.dtype, compute_dtype, out_dtype, x_buffers, vmem_limit)(
        x, w1_p, b1_p, w2_p, b2_p, w3_p, b3_p)

    return y if out_p == out_dim else y[:, :out_dim]


def init_fcnn_params(key, in_dim, hidden_dim, out_dim, dtype=jnp.float32):
    """Deterministic init mirroring nn.Linear shapes.

    PyTorch nn.Linear stores weight as (out_features, in_features); we keep the
    transposed (in_features, out_features) layout so the kernel computes
    x @ W + b, numerically identical to x @ W_pt.T + b.
    """
    ks = jax.random.split(key, 6)

    def linear(kw, kb, fan_in, fan_out):
        bound = 1.0 / jnp.sqrt(fan_in)
        w = jax.random.uniform(kw, (fan_in, fan_out), dtype, -bound, bound)
        b = jax.random.uniform(kb, (1, fan_out), dtype, -bound, bound)
        return w, b

    w1, b1 = linear(ks[0], ks[1], in_dim, hidden_dim)
    w2, b2 = linear(ks[2], ks[3], hidden_dim, hidden_dim)
    w3, b3 = linear(ks[4], ks[5], hidden_dim, out_dim)
    return (w1, b1, w2, b2, w3, b3)


def fcnn_reference(x, params):
    """Plain-JAX reference of the same forward pass."""
    w1, b1, w2, b2, w3, b3 = params
    h = jnp.tanh(x @ w1 + b1)
    h = jnp.tanh(h @ w2 + b2)
    return h @ w3 + b3


if __name__ == "__main__":
    key = jax.random.PRNGKey(0)
    k_x, k_x2, k_x3, k_p = jax.random.split(key, 4)

    in_dim, hidden_dim, out_dim = 16, 32, 4
    params = init_fcnn_params(k_p, in_dim, hidden_dim, out_dim)

    # 1) Default path: bf16 MXU operands, f32 accumulation/tanh, f32 output.
    x = jax.random.normal(k_x, (8, in_dim), dtype=jnp.float32)
    ref = fcnn_reference(x, params)
    out = jax.block_until_ready(fcnn_forward(x, params))
    assert out.shape == (8, out_dim)
    assert out.dtype == jnp.float32
    assert jnp.allclose(out, ref, atol=5e-2, rtol=5e-2), "bf16-default mismatch"

    # 2) f32 operands (exact), multi-step batch grid with a partial last tile.
    x2 = jax.random.normal(k_x2, (20, in_dim), dtype=jnp.float32)
    ref2 = fcnn_reference(x2, params)
    out2 = jax.block_until_ready(
        fcnn_forward(x2, params, compute_dtype=jnp.float32, batch_tile=8))
    assert out2.shape == (20, out_dim)
    assert jnp.allclose(out2, ref2, atol=1e-5, rtol=1e-5), "f32 tiled mismatch"

    # 3) bf16 operands AND bf16 output (halved writeback); 16-row batch matches
    #    the bf16 output's 16-sublane minimum.
    x3 = jax.random.normal(k_x3, (16, in_dim), dtype=jnp.float32)
    ref3 = fcnn_reference(x3, params)
    out3 = jax.block_until_ready(fcnn_forward(x3, params, out_dtype=jnp.bfloat16))
    assert out3.shape == (16, out_dim)
    assert out3.dtype == jnp.bfloat16
    assert jnp.allclose(out3.astype(jnp.float32), ref3, atol=5e-2, rtol=5e-2), \
        "bf16-out mismatch"

    print("KERNEL_OK")
</pallas_src>

<mosaic_0001>
module attributes {stable_mosaic.version = 11 : i64} {
  func.func @fcnn_kernel(%arg0: i32, %arg1: memref<8x16xf32, #tpu.memory_space<vmem>>, %arg2: memref<16x128xbf16, #tpu.memory_space<vmem>>, %arg3: memref<1x128xf32, #tpu.memory_space<vmem>>, %arg4: memref<128x128xbf16, #tpu.memory_space<vmem>>, %arg5: memref<1x128xf32, #tpu.memory_space<vmem>>, %arg6: memref<128x128xbf16, #tpu.memory_space<vmem>>, %arg7: memref<1x128xf32, #tpu.memory_space<vmem>>, %arg8: memref<8x128xf32, #tpu.memory_space<vmem>>) attributes {dimension_semantics = [#tpu.dimension_semantics<parallel>], iteration_bounds = array<i64: 1>, scalar_prefetch = 0 : i64, scratch_operands = 0 : i64, tpu.core_type = #tpu.core_type<tc>, window_params = [{transform_indices = @transform_0, window_bounds = array<i64: 8, 16>}, {pipeline_mode = #tpu.pipeline_mode<synchronous>, transform_indices = @transform_1, window_bounds = array<i64: 16, 128>}, {pipeline_mode = #tpu.pipeline_mode<synchronous>, transform_indices = @transform_2, window_bounds = array<i64: 1, 128>}, {pipeline_mode = #tpu.pipeline_mode<synchronous>, transform_indices = @transform_3, window_bounds = array<i64: 128, 128>}, {pipeline_mode = #tpu.pipeline_mode<synchronous>, transform_indices = @transform_4, window_bounds = array<i64: 1, 128>}, {pipeline_mode = #tpu.pipeline_mode<synchronous>, transform_indices = @transform_5, window_bounds = array<i64: 128, 128>}, {pipeline_mode = #tpu.pipeline_mode<synchronous>, transform_indices = @transform_6, window_bounds = array<i64: 1, 128>}, {transform_indices = @transform_7, window_bounds = array<i64: 8, 128>}]} {
    %c0 = arith.constant 0 : index
    %c0_0 = arith.constant 0 : index
    %0 = vector.load %arg1[%c0, %c0_0] : memref<8x16xf32, #tpu.memory_space<vmem>>, vector<8x16xf32>
    %1 = arith.truncf %0 : vector<8x16xf32> to vector<8x16xbf16>
    %c0_1 = arith.constant 0 : index
    %c0_2 = arith.constant 0 : index
    %2 = vector.load %arg2[%c0_1, %c0_2] : memref<16x128xbf16, #tpu.memory_space<vmem>>, vector<16x128xbf16>
    %cst = arith.constant dense<0.000000e+00> : vector<8x128xf32>
    %3 = tpu.matmul %1, %2, %cst {dimension_numbers = #tpu.dot_dimension_numbers<[1], [0], [0], [1], [0, 0, 1, 1], [], []>} : vector<8x16xbf16>, vector<16x128xbf16>, vector<8x128xf32> -> vector<8x128xf32>
    %c0_3 = arith.constant 0 : index
    %c0_4 = arith.constant 0 : index
    %4 = vector.load %arg3[%c0_3, %c0_4] : memref<1x128xf32, #tpu.memory_space<vmem>>, vector<1x128xf32>
    %5 = vector.broadcast %4 : vector<1x128xf32> to vector<8x128xf32>
    %6 = arith.addf %3, %5 : vector<8x128xf32>
    %7 = math.tanh %6 : vector<8x128xf32>
    %8 = arith.truncf %7 : vector<8x128xf32> to vector<8x128xbf16>
    %c0_5 = arith.constant 0 : index
    %c0_6 = arith.constant 0 : index
    %9 = vector.load %arg4[%c0_5, %c0_6] : memref<128x128xbf16, #tpu.memory_space<vmem>>, vector<128x128xbf16>
    %cst_7 = arith.constant dense<0.000000e+00> : vector<8x128xf32>
    %10 = tpu.matmul %8, %9, %cst_7 {dimension_numbers = #tpu.dot_dimension_numbers<[1], [0], [0], [1], [0, 0, 1, 1], [], []>} : vector<8x128xbf16>, vector<128x128xbf16>, vector<8x128xf32> -> vector<8x128xf32>
    %c0_8 = arith.constant 0 : index
    %c0_9 = arith.constant 0 : index
    %11 = vector.load %arg5[%c0_8, %c0_9] : memref<1x128xf32, #tpu.memory_space<vmem>>, vector<1x128xf32>
    %12 = vector.broadcast %11 : vector<1x128xf32> to vector<8x128xf32>
    %13 = arith.addf %10, %12 : vector<8x128xf32>
    %14 = math.tanh %13 : vector<8x128xf32>
    %15 = arith.truncf %14 : vector<8x128xf32> to vector<8x128xbf16>
    %c0_10 = arith.constant 0 : index
    %c0_11 = arith.constant 0 : index
    %16 = vector.load %arg6[%c0_10, %c0_11] : memref<128x128xbf16, #tpu.memory_space<vmem>>, vector<128x128xbf16>
    %cst_12 = arith.constant dense<0.000000e+00> : vector<8x128xf32>
    %17 = tpu.matmul %15, %16, %cst_12 {dimension_numbers = #tpu.dot_dimension_numbers<[1], [0], [0], [1], [0, 0, 1, 1], [], []>} : vector<8x128xbf16>, vector<128x128xbf16>, vector<8x128xf32> -> vector<8x128xf32>
    %c0_13 = arith.constant 0 : index
    %c0_14 = arith.constant 0 : index
    %18 = vector.load %arg7[%c0_13, %c0_14] : memref<1x128xf32, #tpu.memory_space<vmem>>, vector<1x128xf32>
    %19 = vector.broadcast %18 : vector<1x128xf32> to vector<8x128xf32>
    %20 = arith.addf %17, %19 : vector<8x128xf32>
    %c0_15 = arith.constant 0 : index
    %c0_16 = arith.constant 0 : index
    %21 = vector.load %arg8[%c0_15, %c0_16] : memref<8x128xf32, #tpu.memory_space<vmem>>, vector<8x128xf32>
    tpu.vector_store %arg8[%c0_15, %c0_16], %20 {strides = array<i32>} : memref<8x128xf32, #tpu.memory_space<vmem>>, vector<8x128xf32>,
    return
  }
  func.func @transform_0(%arg0: i32) -> (i32, i32) {
    %c0_i32 = arith.constant 0 : i32
    %c0_i32_0 = arith.constant 0 : i32
    return %arg0, %c0_i32 : i32, i32
  }
  func.func @transform_1(%arg0: i32) -> (i32, i32) {
    %c0_i32 = arith.constant 0 : i32
    %c0_i32_0 = arith.constant 0 : i32
    %c0_i32_1 = arith.constant 0 : i32
    return %c0_i32, %c0_i32_0 : i32, i32
  }
  func.func @transform_2(%arg0: i32) -> (i32, i32) {
    %c0_i32 = arith.constant 0 : i32
    %c0_i32_0 = arith.constant 0 : i32
    %c0_i32_1 = arith.constant 0 : i32
    return %c0_i32, %c0_i32_0 : i32, i32
  }
  func.func @transform_3(%arg0: i32) -> (i32, i32) {
    %c0_i32 = arith.constant 0 : i32
    %c0_i32_0 = arith.constant 0 : i32
    %c0_i32_1 = arith.constant 0 : i32
    return %c0_i32, %c0_i32_0 : i32, i32
  }
  func.func @transform_4(%arg0: i32) -> (i32, i32) {
    %c0_i32 = arith.constant 0 : i32
    %c0_i32_0 = arith.constant 0 : i32
    %c0_i32_1 = arith.constant 0 : i32
    return %c0_i32, %c0_i32_0 : i32, i32
  }
  func.func @transform_5(%arg0: i32) -> (i32, i32) {
    %c0_i32 = arith.constant 0 : i32
    %c0_i32_0 = arith.constant 0 : i32
    %c0_i32_1 = arith.constant 0 : i32
    return %c0_i32, %c0_i32_0 : i32, i32
  }
  func.func @transform_6(%arg0: i32) -> (i32, i32) {
    %c0_i32 = arith.constant 0 : i32
    %c0_i32_0 = arith.constant 0 : i32
    %c0_i32_1 = arith.constant 0 : i32
    return %c0_i32, %c0_i32_0 : i32, i32
  }
  func.func @transform_7(%arg0: i32) -> (i32, i32) {
    %c0_i32 = arith.constant 0 : i32
    %c0_i32_0 = arith.constant 0 : i32
    return %arg0, %c0_i32 : i32, i32
  }
}

</mosaic_0001>

<bundles_post_ra>
// kernel: tpu_custom_call.1
= control target key start
LH: loop header
LB: loop body
LE: loop exit
PB: predicated region body
PF: predicated region fallthrough
CT: control target
= control target key end

     0   :  { %12 = vsyncpa [#allocation3], 0  ;;  %s605_s0 = inlined_call_operand.hbm [shape: f32[8,16], index: 0, kind: input, shape index: {}]   ;;  %s606_s1 = inlined_call_operand.hbm [shape: bf16[16,128], index: 1, kind: input, shape index: {}]   ;;  %s607_s2 = inlined_call_operand.vmem [shape: f32[1,128], index: 2, kind: input, shape index: {}]   ;;  %s608_s3 = inlined_call_operand.hbm [shape: bf16[128,128], index: 3, kind: input, shape index: {}]   ;;  %s609_s4 = inlined_call_operand.vmem [shape: f32[1,128], index: 4, kind: input, shape index: {}]   ;;  %s610_s5 = inlined_call_operand.hbm [shape: bf16[128,128], index: 5, kind: input, shape index: {}]   ;;  %s611_s6 = inlined_call_operand.vmem [shape: f32[1,128], index: 6, kind: input, shape index: {}]   ;;  %s612_s7 = inlined_call_operand.hbm [shape: f32[8,128], index: 7, kind: output, shape index: {}]  }
   0x1   :  { %13 = vsyncpa [#allocation6], 0 }
   0x2   :  { %14 = vsyncpa [#allocation9], 0  ;;  %s31_s26 = sshll.u32 %s606_s1, 4  ;;  %s32_s26 = int_to_ptr.hbm [resolvable:$true] %s31_s26 }
   0x3   :  { %15 = vsyncpa [#allocation4], 0  ;;  %s534_s27 = smov [#allocation5]   ;;  %s21_s8 = sshll.u32 %s605_s0, 4  ;;  %s22_s8 = int_to_ptr.hbm [resolvable:$true] %s21_s8 }
   0x4   :  { %s33_s28 = sshll.u32 %s534_s27, 4  ;;  %s535_s9 = smov 64   ;;  %s34_s28 = int_to_ptr.vmem [resolvable:$true] %s33_s28 }
   0x5   :  { %s536_s10 = smov 4   ;;  %s537_s11 = smov [#allocation2]  }
   0x6   :  { %39 = dma.hbm_to_vmem [thread:$0]  %s32_s26, 128, %s34_s28, [#allocation6], %s535_s9, %s535_s9, %s536_s10  }
   0x7   :  { %s23_s12 = sshll.u32 %s537_s11, 4  ;;  %s46_s15 = sshll.u32 %s608_s3, 4  ;;  %s24_s12 = int_to_ptr.vmem [resolvable:$true] %s23_s12  ;;  %s47_s15 = int_to_ptr.hbm [resolvable:$true] %s46_s15 }
   0x8   :  { %26 = dma.hbm_to_vmem [thread:$0]  %s22_s8, 128, %s24_s12, [#allocation3]  }
   0x9   :  { %s61_s17 = sshll.u32 %s610_s5, 4  ;;  %s538_s18 = smov [#allocation7]   ;;  %s62_s17 = int_to_ptr.hbm [resolvable:$true] %s61_s17 }
   0xa   :  { %s48_s19 = sshll.u32 %s538_s18, 4  ;;  %s539_s0 = smov [#allocation8]   ;;  %s49_s19 = int_to_ptr.vmem [resolvable:$true] %s48_s19 }
   0xb   :  { %54 = dma.hbm_to_vmem [thread:$0]  %s47_s15, 1024, %s49_s19, [#allocation6], %s535_s9, %s535_s9, %s536_s10  }
   0xc   :  { %s63_s20 = sshll.u32 %s539_s0, 4  ;;  %s64_s20 = int_to_ptr.vmem [resolvable:$true] %s63_s20 }
   0xd   :  { %69 = dma.hbm_to_vmem [thread:$0]  %s62_s17, 1024, %s64_s20, [#allocation9], %s535_s9, %s535_s9, %s536_s10  }
   0xe   :  { %526 = dma.done.wait [#allocation3], 128  }
   0xf   :  { %527 = vsyncadd [#allocation3], 4294967168 }
  0x10   :  { %528 = dma.done.wait [#allocation6], 1152  }
  0x11   :  { %529 = vsyncadd [#allocation6], 4294966144 }
  0x12   :  { %530 = dma.done.wait [#allocation9], 1024  }
  0x13   :  { %531 = vsyncadd [#allocation9], 4294966272  ;;  %v375_v0 = vld [vmem:[#allocation5] sm:$0xff]  ;;  %v89_v1 = vld [vmem:[#allocation2] sm:$0xff]  ;;  %vm103_vm0 = vcmask 130048   ;;  %s540_s24 = smov [#allocation10]  }
  0x14   :  { %v383_v2 = vld [vmem:[#allocation7 + $0x38] sm:$0xff]  ;;  %v90_v3 = vpack.c.bf16 %v89_v1, %v89_v1  ;;  %114 = vmatpush.bf16.msra.mxu0 %v375_v0  ;;  %v382_v4 = vld [vmem:[#allocation7 + $0x30] sm:$0xff]  ;;  %v381_v5 = vld [vmem:[#allocation7 + $0x28] sm:$0xff]  ;;  %s292_s25 = sshll.u32 %s540_s24, 4  ;;  %s294_s28 = sshll.u32 %s612_s7, 4  ;;  %s293_s25 = int_to_ptr.vmem [resolvable:$true] %s292_s25  ;;  %s295_s28 = int_to_ptr.hbm [resolvable:$true] %s294_s28 }
  0x15   :  { %190 = vmatpush.bf16.msra.mxu1 %v383_v2  ;;  %v380_v6 = vld [vmem:[#allocation7 + $0x20] sm:$0xff]  ;;  %v379_v7 = vld [vmem:[#allocation7 + $0x18] sm:$0xff]  ;;  %v378_v8 = vld [vmem:[#allocation7 + $0x10] sm:$0xff] }
  0x16   :  { %v377_v9 = vld [vmem:[#allocation7 + $0x8] sm:$0xff]  ;;  %v376_v10 = vld [vmem:[#allocation7] sm:$0xff]  ;;  %v391_v11 = vld [vmem:[#allocation8 + $0x38] sm:$0xff] }
  0x17   :  { %310 = vmatmul.msk.bf16.vlgmr.msra.gmra.mxu0 %vm103_vm0, %v90_v3  ;;  %273 = vmatpush.bf16.msra.mxu2 %v391_v11  ;;  %v390_v12 = vld [vmem:[#allocation8 + $0x30] sm:$0xff]  ;;  %v389_v13 = vld [vmem:[#allocation8 + $0x28] sm:$0xff]  ;;  %v388_v14 = vld [vmem:[#allocation8 + $0x20] sm:$0xff] }
  0x18   :  { %v387_v15 = vld [vmem:[#allocation8 + $0x18] sm:$0xff]  ;;  %v399_v16 = vld [vmem:[%s607_s2] ss:$0 sm:$0xff]  ;;  %v385_v23 = vld [vmem:[#allocation8 + $0x8] sm:$0xff] }
  0x19   :  { %191 = vmatpush.bf16.msra.mxu1 %v382_v4  ;;  %v386_v22 = vld [vmem:[#allocation8 + $0x10] sm:$0xff]  ;;  %v384_v24 = vld [vmem:[#allocation8] sm:$0xff] }
  0x1a   :  { %v400_v25 = vld [vmem:[%s609_s4] ss:$0 sm:$0xff] }
  0x1b   :  { %274 = vmatpush.bf16.msra.mxu2 %v390_v12  ;;  %v401_v31 = vld [vmem:[%s611_s6] ss:$0 sm:$0xff] }
  0x1d   :  { %192 = vmatpush.bf16.msra.mxu1 %v381_v5 }
  0x1f   :  { %275 = vmatpush.bf16.msra.mxu2 %v389_v13 }
  0x21   :  { %193 = vmatpush.bf16.msra.mxu1 %v380_v6 }
  0x23   :  { %276 = vmatpush.bf16.msra.mxu2 %v388_v14 }
  0x25   :  { %194 = vmatpush.bf16.msra.mxu1 %v379_v7 }
  0x27   :  { %277 = vmatpush.bf16.msra.mxu2 %v387_v15 }
  0x29   :  { %195 = vmatpush.bf16.msra.mxu1 %v378_v8 }
  0x2b   :  { %278 = vmatpush.bf16.msra.mxu2 %v386_v22 }
  0x2d   :  { %196 = vmatpush.bf16.msra.mxu1 %v377_v9 }
  0x2f   :  { %279 = vmatpush.bf16.msra.mxu2 %v385_v23 }
  0x31   :  { %197 = vmatpush.bf16.msra.mxu1 %v376_v10 }
  0x33   :  { %280 = vmatpush.bf16.msra.mxu2 %v384_v24 }
  0x94   :  { %v116_v17 = vpop.f32.mrf.mxu0 }
  0x95   :  { %v117_v18 = vadd.f32 %v399_v16, %v116_v17 }
  0x97   :  { %402 = vtanh.f32 %v117_v18 }
  0x9c   :  { %v118_v19 = vpop.f32.mrf.mxu0 }
  0x9d   :  { %v403_v20 = vpop.eup %402 }
  0x9e   :  { %v121_v21 = vpack.c.bf16 %v403_v20, %v403_v20 }
  0xa0   :  { %198 = vmatmul.bf16.vlgmr.msra.gmra.mxu1 %v121_v21 }
 0x11d   :  { %v199_v26 = vpop.f32.mrf.mxu1 }
 0x11e   :  { %v200_v27 = vadd.f32 %v400_v25, %v199_v26 }
 0x120   :  { %404 = vtanh.f32 %v200_v27 }
 0x125   :  { %v201_v28 = vpop.f32.mrf.mxu1 }
 0x126   :  { %v405_v29 = vpop.eup %404 }
 0x127   :  { %v204_v30 = vpack.c.bf16 %v405_v29, %v405_v29 }
 0x129   :  { %281 = vmatmul.bf16.vlgmr.msra.gmra.mxu2 %v204_v30 }
 0x1ac   :  { %v282_v32 = vpop.f32.mrf.mxu2 }
 0x1ad   :  { %v283_v33 = vadd.f32 %v401_v31, %v282_v32 }
 0x1af   :  { %286 = vst [vmem:[#allocation10] sm:$0xff] %v283_v33 }
 0x1b0   :  { %297 = dma.vmem_to_hbm [thread:$0]  %s293_s25, 128, %s295_s28, [#allocation4]  }
 0x1b4   :  { %v284_v34 = vpop.f32.mrf.mxu2 }
 0x1b5   :  { %532 = dma.done.wait [#allocation4], 128  }
 0x1b6   :  { %533 = vsyncadd [#allocation4], 4294967168 }
 0x1b7   :  { %302 = vsyncpa [#allocation3], 1 }
 0x1b8   :  { %303 = vsyncpa [#allocation6], 1 }
 0x1b9   :  { %304 = vsyncpa [#allocation9], 1 }
 0x1ba   :  { %305 = vsyncpa [#allocation4], 1 }

</bundles_post_ra>
